<compile_context>
chip_gen: v6e
topology: v6e:2x2x1
jax: 0.10.0
libtpu: 0.0.40
codegen_flags: <defaults>
</compile_context>

<pallas_src>
import functools

import jax
import jax.numpy as jnp
from jax.experimental import pallas as pl
from jax.experimental.pallas import tpu as pltpu

D = 768          # fixed by the module (LayerNorm((768,)), Linear(in=768))
EPS = 1e-6


def _round_up(n, m):
    return ((n + m - 1) // m) * m


def _mlp_cls_kernel(x_ref, gamma_ref, beta_ref, w_ref, b_ref, o_ref, *, use_bf16_matmul):
    # x_ref:     (TB, D)       current batch tile (ragged last tile masked by Pallas)
    # gamma_ref: (1, D)        VMEM-resident (constant index_map)
    # beta_ref:  (1, D)        VMEM-resident
    # w_ref:     (D, C_pad)    VMEM-resident, lane-padded to a multiple of 128
    # b_ref:     (1, C_pad)    VMEM-resident
    # o_ref:     (TB, C_pad)
    x = x_ref[...].astype(jnp.float32)

    # --- LayerNorm over last dim: two-pass (x - mean) variance, biased like torch ---
    inv_d = jnp.float32(1.0 / D)
    mean = jnp.sum(x, axis=-1, keepdims=True) * inv_d
    xc = x - mean
    var = jnp.sum(xc * xc, axis=-1, keepdims=True) * inv_d
    inv = jax.lax.rsqrt(var + EPS)
    y = xc * inv
    y = y * gamma_ref[...].astype(jnp.float32) + beta_ref[...].astype(jnp.float32)

    # --- Identity: no-op ---

    # --- Linear: y @ W_pad + b_pad (MXU, f32 accumulate) ---
    if use_bf16_matmul:
        # v5e / v7x option: halves MXU passes; ~1e-3 abs logit error.
        out = jnp.dot(y.astype(jnp.bfloat16), w_ref[...].astype(jnp.bfloat16),
                      preferred_element_type=jnp.float32)
    else:
        out = jnp.dot(y, w_ref[...].astype(jnp.float32),
                      preferred_element_type=jnp.float32)
    out = out + b_ref[...].astype(jnp.float32)
    o_ref[...] = out.astype(o_ref.dtype)


def prepack_params(gamma, beta, weight, bias):
    """One-time repack (call at parameter-load time, NOT per forward call).

    weight: (num_classes, 768) PyTorch layout; returns (gamma2, beta2, w_pad, b_pad, C).
    """
    C = weight.shape[0]
    C_pad = _round_up(C, 128)
    gamma2 = gamma.reshape(1, D)
    beta2 = beta.reshape(1, D)
    w_pad = jnp.zeros((D, C_pad), weight.dtype).at[:, :C].set(weight.T)
    b_pad = jnp.zeros((1, C_pad), bias.dtype).at[0, :C].set(bias)
    return gamma2, beta2, w_pad, b_pad, C


def mlp_cls_new_prepacked(x, gamma2, beta2, w_pad, b_pad, num_classes, *,
                          tb=512, use_bf16_matmul=False):
    """x: (B, 768); params already prepacked by prepack_params()."""
    B, d = x.shape
    assert d == D
    C_pad = w_pad.shape[1]

    # Batch tile: <=512 rows, but prefer >=4 grid steps (v7x megacore sharding)
    # with a 256-row floor; tiny batches collapse to a single 8-row-aligned tile.
    TB = min(tb, _round_up(B, 8))
    TB = max(min(TB, _round_up(pl.cdiv(B, 4), 8)), min(256, _round_up(B, 8)))

    grid = (pl.cdiv(B, TB),)   # ragged last block handled by Pallas masking

    kernel = functools.partial(_mlp_cls_kernel, use_bf16_matmul=use_bf16_matmul)

    out = pl.pallas_call(
        kernel,
        out_shape=jax.ShapeDtypeStruct((B, C_pad), x.dtype),
        grid=grid,
        in_specs=[
            pl.BlockSpec((TB, D), lambda i: (i, 0)),        # streamed batch tiles
            pl.BlockSpec((1, D), lambda i: (0, 0)),         # resident params
            pl.BlockSpec((1, D), lambda i: (0, 0)),
            pl.BlockSpec((D, C_pad), lambda i: (0, 0)),
            pl.BlockSpec((1, C_pad), lambda i: (0, 0)),
        ],
        out_specs=pl.BlockSpec((TB, C_pad), lambda i: (i, 0)),
        compiler_params=pltpu.CompilerParams(
            dimension_semantics=("parallel",),              # megacore on v7x
        ),
    )(x, gamma2, beta2, w_pad, b_pad)

    # Slice off the class-dim lane padding outside the kernel (no batch padding used).
    return out[:, :num_classes]


def mlp_cls_new(x, gamma, beta, weight, bias, *, tb=512, use_bf16_matmul=False):
    """Convenience wrapper matching the PyTorch module signature (prepacks per call;
    prefer prepack_params() + mlp_cls_new_prepacked() in a real serving path)."""
    gamma2, beta2, w_pad, b_pad, C = prepack_params(gamma, beta, weight, bias)
    return mlp_cls_new_prepacked(x, gamma2, beta2, w_pad, b_pad, C,
                                 tb=tb, use_bf16_matmul=use_bf16_matmul)


def _reference(x, gamma, beta, weight, bias):
    mean = jnp.mean(x, axis=-1, keepdims=True)
    var = jnp.mean((x - mean) ** 2, axis=-1, keepdims=True)
    y = (x - mean) / jnp.sqrt(var + EPS) * gamma + beta
    return y @ weight.T + bias


if __name__ == "__main__":
    num_classes = 10
    B = 4   # small, deliberately NOT a multiple of the tile size (ragged-grid path)

    key = jax.random.PRNGKey(0)
    kx, kg, kb, kw, kbias = jax.random.split(key, 5)

    x = jax.random.normal(kx, (B, D), dtype=jnp.float32)

    # Deterministic parameter init (shapes match the PyTorch module).
    gamma = jnp.ones((D,), jnp.float32) + 0.01 * jax.random.normal(kg, (D,), jnp.float32)
    beta = 0.01 * jax.random.normal(kb, (D,), jnp.float32)
    bound = 1.0 / jnp.sqrt(jnp.float32(D))
    weight = jax.random.uniform(kw, (num_classes, D), jnp.float32, -bound, bound)
    bias = jax.random.uniform(kbias, (num_classes,), jnp.float32, -bound, bound)

    # Prepack once (load time), then run the kernel on un-padded x.
    gamma2, beta2, w_pad, b_pad, C = prepack_params(gamma, beta, weight, bias)
    out = mlp_cls_new_prepacked(x, gamma2, beta2, w_pad, b_pad, C)
    out = jax.block_until_ready(out)

    ref = _reference(x, gamma, beta, weight, bias)
    assert out.shape == (B, num_classes)
    assert jnp.allclose(out, ref, atol=1e-4, rtol=1e-4), "mismatch vs reference"

    print("KERNEL_OK")
</pallas_src>

<mosaic_0001>
module attributes {stable_mosaic.version = 11 : i64} {
  func.func @_mlp_cls_kernel(%arg0: i32, %arg1: memref<8x768xf32, #tpu.memory_space<vmem>>, %arg2: memref<1x768xf32, #tpu.memory_space<vmem>>, %arg3: memref<1x768xf32, #tpu.memory_space<vmem>>, %arg4: memref<768x128xf32, #tpu.memory_space<vmem>>, %arg5: memref<1x128xf32, #tpu.memory_space<vmem>>, %arg6: memref<8x128xf32, #tpu.memory_space<vmem>>) attributes {dimension_semantics = [#tpu.dimension_semantics<parallel>], iteration_bounds = array<i64: 1>, scalar_prefetch = 0 : i64, scratch_operands = 0 : i64, tpu.core_type = #tpu.core_type<tc>, window_params = [{transform_indices = @transform_0, window_bounds = array<i64: 8, 768>}, {pipeline_mode = #tpu.pipeline_mode<synchronous>, transform_indices = @transform_1, window_bounds = array<i64: 1, 768>}, {pipeline_mode = #tpu.pipeline_mode<synchronous>, transform_indices = @transform_2, window_bounds = array<i64: 1, 768>}, {pipeline_mode = #tpu.pipeline_mode<synchronous>, transform_indices = @transform_3, window_bounds = array<i64: 768, 128>}, {pipeline_mode = #tpu.pipeline_mode<synchronous>, transform_indices = @transform_4, window_bounds = array<i64: 1, 128>}, {transform_indices = @transform_5, window_bounds = array<i64: 8, 128>}]} {
    %c0 = arith.constant 0 : index
    %c0_0 = arith.constant 0 : index
    %0 = vector.load %arg1[%c0, %c0_0] : memref<8x768xf32, #tpu.memory_space<vmem>>, vector<8x768xf32>
    %cst = arith.constant dense<0.000000e+00> : vector<8xf32>
    %1 = vector.multi_reduction <add>, %0, %cst [1] : vector<8x768xf32> to vector<8xf32>
    %2 = vector.shape_cast %1 : vector<8xf32> to vector<8x1xf32>
    %cst_1 = arith.constant 0.00130208337 : f32
    %3 = vector.broadcast %cst_1 : f32 to vector<8x1xf32>
    %4 = arith.mulf %2, %3 : vector<8x1xf32>
    %5 = vector.broadcast %4 : vector<8x1xf32> to vector<8x768xf32>
    %6 = arith.subf %0, %5 : vector<8x768xf32>
    %7 = arith.mulf %6, %6 : vector<8x768xf32>
    %cst_2 = arith.constant dense<0.000000e+00> : vector<8xf32>
    %8 = vector.multi_reduction <add>, %7, %cst_2 [1] : vector<8x768xf32> to vector<8xf32>
    %9 = vector.shape_cast %8 : vector<8xf32> to vector<8x1xf32>
    %cst_3 = arith.constant 0.00130208337 : f32
    %10 = vector.broadcast %cst_3 : f32 to vector<8x1xf32>
    %11 = arith.mulf %9, %10 : vector<8x1xf32>
    %cst_4 = arith.constant 9.99999997E-7 : f32
    %12 = vector.broadcast %cst_4 : f32 to vector<8x1xf32>
    %13 = arith.addf %11, %12 : vector<8x1xf32>
    %14 = math.rsqrt %13 : vector<8x1xf32>
    %15 = vector.broadcast %14 : vector<8x1xf32> to vector<8x768xf32>
    %16 = arith.mulf %6, %15 : vector<8x768xf32>
    %c0_5 = arith.constant 0 : index
    %c0_6 = arith.constant 0 : index
    %17 = vector.load %arg2[%c0_5, %c0_6] : memref<1x768xf32, #tpu.memory_space<vmem>>, vector<1x768xf32>
    %18 = vector.broadcast %17 : vector<1x768xf32> to vector<8x768xf32>
    %19 = arith.mulf %16, %18 : vector<8x768xf32>
    %c0_7 = arith.constant 0 : index
    %c0_8 = arith.constant 0 : index
    %20 = vector.load %arg3[%c0_7, %c0_8] : memref<1x768xf32, #tpu.memory_space<vmem>>, vector<1x768xf32>
    %21 = vector.broadcast %20 : vector<1x768xf32> to vector<8x768xf32>
    %22 = arith.addf %19, %21 : vector<8x768xf32>
    %c0_9 = arith.constant 0 : index
    %c0_10 = arith.constant 0 : index
    %23 = vector.load %arg4[%c0_9, %c0_10] : memref<768x128xf32, #tpu.memory_space<vmem>>, vector<768x128xf32>
    %cst_11 = arith.constant dense<0.000000e+00> : vector<8x128xf32>
    %24 = tpu.matmul %22, %23, %cst_11 {dimension_numbers = #tpu.dot_dimension_numbers<[1], [0], [0], [1], [0, 0, 1, 1], [], []>} : vector<8x768xf32>, vector<768x128xf32>, vector<8x128xf32> -> vector<8x128xf32>
    %c0_12 = arith.constant 0 : index
    %c0_13 = arith.constant 0 : index
    %25 = vector.load %arg5[%c0_12, %c0_13] : memref<1x128xf32, #tpu.memory_space<vmem>>, vector<1x128xf32>
    %26 = vector.broadcast %25 : vector<1x128xf32> to vector<8x128xf32>
    %27 = arith.addf %24, %26 : vector<8x128xf32>
    %c0_14 = arith.constant 0 : index
    %c0_15 = arith.constant 0 : index
    %28 = vector.load %arg6[%c0_14, %c0_15] : memref<8x128xf32, #tpu.memory_space<vmem>>, vector<8x128xf32>
    tpu.vector_store %arg6[%c0_14, %c0_15], %27 {strides = array<i32>} : memref<8x128xf32, #tpu.memory_space<vmem>>, vector<8x128xf32>,
    return
  }
  func.func @transform_0(%arg0: i32) -> (i32, i32) {
    %c0_i32 = arith.constant 0 : i32
    %c0_i32_0 = arith.constant 0 : i32
    return %arg0, %c0_i32 : i32, i32
  }
  func.func @transform_1(%arg0: i32) -> (i32, i32) {
    %c0_i32 = arith.constant 0 : i32
    %c0_i32_0 = arith.constant 0 : i32
    %c0_i32_1 = arith.constant 0 : i32
    return %c0_i32, %c0_i32_0 : i32, i32
  }
  func.func @transform_2(%arg0: i32) -> (i32, i32) {
    %c0_i32 = arith.constant 0 : i32
    %c0_i32_0 = arith.constant 0 : i32
    %c0_i32_1 = arith.constant 0 : i32
    return %c0_i32, %c0_i32_0 : i32, i32
  }
  func.func @transform_3(%arg0: i32) -> (i32, i32) {
    %c0_i32 = arith.constant 0 : i32
    %c0_i32_0 = arith.constant 0 : i32
    %c0_i32_1 = arith.constant 0 : i32
    return %c0_i32, %c0_i32_0 : i32, i32
  }
  func.func @transform_4(%arg0: i32) -> (i32, i32) {
    %c0_i32 = arith.constant 0 : i32
    %c0_i32_0 = arith.constant 0 : i32
    %c0_i32_1 = arith.constant 0 : i32
    return %c0_i32, %c0_i32_0 : i32, i32
  }
  func.func @transform_5(%arg0: i32) -> (i32, i32) {
    %c0_i32 = arith.constant 0 : i32
    %c0_i32_0 = arith.constant 0 : i32
    return %arg0, %c0_i32 : i32, i32
  }
}

</mosaic_0001>

<bundles_post_ra>
// kernel: tpu_custom_call.1
= control target key start
LH: loop header
LB: loop body
LE: loop exit
PB: predicated region body
PF: predicated region fallthrough
CT: control target
= control target key end

     0   :  { %10 = vsyncpa [#allocation3], 0  ;;  %s975_s0 = inlined_call_operand.hbm [shape: f32[4,768], index: 0, kind: input, shape index: {}]   ;;  %s976_s1 = inlined_call_operand.hbm [shape: f32[1,768], index: 1, kind: input, shape index: {}]   ;;  %s977_s2 = inlined_call_operand.hbm [shape: f32[1,768], index: 2, kind: input, shape index: {}]   ;;  %s978_s3 = inlined_call_operand.hbm [shape: f32[768,128], index: 3, kind: input, shape index: {}]   ;;  %s979_s4 = inlined_call_operand.vmem [shape: f32[1,128], index: 4, kind: input, shape index: {}]   ;;  %s980_s5 = inlined_call_operand.hbm [shape: f32[4,128], index: 5, kind: output, shape index: {}]  }
   0x1   :  { %11 = vsyncpa [#allocation6], 0 }
   0x2   :  { %12 = vsyncpa [#allocation9], 0 }
   0x3   :  { %13 = vsyncpa [#allocation4], 0 }
   0x4   :  { %18 = vsyncadd [#allocation3], 384  ;;  %s858_s18 = smov [#allocation5]   ;;  %s859_s20 = smov [#allocation2]  }
   0x5   :  { %s32_s19 = sshll.u32 %s858_s18, 4  ;;  %s19_s21 = sshll.u32 %s859_s20, 4  ;;  %s33_s19 = int_to_ptr.vmem [resolvable:$true] %s32_s19  ;;  %s20_s21 = int_to_ptr.vmem [resolvable:$true] %s19_s21 }
   0x6   :  { %s758_s22 = scalar_lea.vmem %s33_s19, 96  ;;  %p763_p1 = scmp.lt.s32.totalorder %s33_s19, %s33_s19 }
   0x7   :  { %p759_p0 = scmp.ne.s32.totalorder %s33_s19, %s758_s22  ;;  %p764_p2 = scmp.lt.s32.totalorder %s758_s22, %s758_s22 }
   0x9   :  { %p765_p3 = por %p764_p2, %p763_p1 }
   0xb   :  { %p766_p4 = pnand %p765_p3, %p759_p0 }
   0xd   :  { %769 = shalt.err (!%p766_p4)
}
   0xe   :  { %35 = dma.hbm_to_vmem [thread:$0]  %s976_s1, 96, %s33_s19, [#allocation6]  }
   0xf   :  { %s778_s25 = scalar_lea.vmem %s20_s21, 384  ;;  %s782_s26 = scalar_lea.vmem %s20_s21, 768 }
  0x10   :  { %p779_p5 = scmp.ne.s32.totalorder %s20_s21, %s778_s25  ;;  %p783_p6 = scmp.lt.s32.totalorder %s20_s21, %s20_s21 }
  0x11   :  { %p784_p7 = scmp.lt.s32.totalorder %s782_s26, %s778_s25 }
  0x13   :  { %p785_p8 = por %p784_p7, %p783_p6 }
  0x15   :  { %p786_p9 = pnand %p785_p8, %p779_p5 }
  0x17   :  { %789 = shalt.err (!%p786_p9)
}
  0x18   :  { %s860_s27 = smov 384   ;;  %s861_s28 = smov 24  }
  0x19   :  { %25 = dma.hbm_to_vmem [thread:$0]  %s975_s0, 384, %s20_s21, [#allocation3], %s860_s27, %s860_s27, %s861_s28  }
  0x1a   :  { %s862_s6 = smov [#allocation7]   ;;  %s863_s8 = smov [#allocation8]  }
  0x1b   :  { %s42_s7 = sshll.u32 %s862_s6, 4  ;;  %s51_s9 = sshll.u32 %s863_s8, 4  ;;  %s43_s7 = int_to_ptr.vmem [resolvable:$true] %s42_s7  ;;  %s52_s9 = int_to_ptr.vmem [resolvable:$true] %s51_s9 }
  0x1c   :  { %s798_s1 = scalar_lea.vmem %s43_s7, 96  ;;  %p803_p11 = scmp.lt.s32.totalorder %s43_s7, %s43_s7 }
  0x1d   :  { %p799_p10 = scmp.ne.s32.totalorder %s43_s7, %s798_s1  ;;  %p804_p12 = scmp.lt.s32.totalorder %s798_s1, %s798_s1 }
  0x1f   :  { %p805_p13 = por %p804_p12, %p803_p11 }
  0x21   :  { %p806_p0 = pnand %p805_p13, %p799_p10 }
  0x23   :  { %809 = shalt.err (!%p806_p0)
}
  0x24   :  { %45 = dma.hbm_to_vmem [thread:$0]  %s977_s2, 96, %s43_s7, [#allocation6]  }
  0x25   :  { %s818_s12 = scalar_lea.vmem %s52_s9, 12288  ;;  %p823_p2 = scmp.lt.s32.totalorder %s52_s9, %s52_s9 }
  0x26   :  { %p819_p1 = scmp.ne.s32.totalorder %s52_s9, %s818_s12  ;;  %p824_p3 = scmp.lt.s32.totalorder %s818_s12, %s818_s12 }
  0x28   :  { %p825_p4 = por %p824_p3, %p823_p2 }
  0x2a   :  { %p826_p5 = pnand %p825_p4, %p819_p1 }
  0x2c   :  { %829 = shalt.err (!%p826_p5)
}
  0x2d   :  { %s864_s0 = smov 128   ;;  %s865_s13 = smov 8  }
  0x2e   :  { %57 = dma.hbm_to_vmem [thread:$0]  %s978_s3, 12288, %s52_s9, [#allocation9], %s864_s0, %s864_s0, %s865_s13  }
  0x2f   :  { %850 = dma.done.wait [#allocation3], 768  }
  0x30   :  { %851 = vsyncadd [#allocation3], 4294966528 }
  0x31   :  { %852 = dma.done.wait [#allocation6], 192  }
  0x32   :  { %853 = vsyncadd [#allocation6], 4294967104 }
  0x33   :  { %854 = dma.done.wait [#allocation9], 12288  }
  0x34   :  { %855 = vsyncadd [#allocation9], 4294955008  ;;  %v72_v0 = vld [vmem:[#allocation2] sm:$0xff]  ;;  %v73_v1 = vld [vmem:[#allocation2 + $0x8] sm:$0xff]  ;;  %v866_v24 = vmov 839922192   ;;  %v108_v26 = vlaneseq }
  0x35   :  { %v75_v2 = vld [vmem:[#allocation2 + $0x18] sm:$0xff]  ;;  %v76_v3 = vld [vmem:[#allocation2 + $0x20] sm:$0xff]  ;;  %v74_v7 = vld [vmem:[#allocation2 + $0x10] sm:$0xff]  ;;  %v106_v25 = vunpack.c.l.s4 %v866_v24  ;;  %v867_v27 = vmov 1985246804  }
  0x36   :  { %v84_v4 = vcombine.low %v72_v0, %v75_v2  ;;  %v85_v5 = vcombine.high %v72_v0, %v75_v2  ;;  %v86_v6 = vcombine.low %v73_v1, %v76_v3  ;;  %v77_v8 = vld [vmem:[#allocation2 + $0x28] sm:$0xff]  ;;  %v87_v9 = vcombine.high %v73_v1, %v76_v3  ;;  %v303_v17 = vld [vmem:[#allocation8 + $0xf8] sm:$0xff] }
  0x37   :  { %v88_v11 = vcombine.low %v74_v7, %v77_v8  ;;  %v89_v13 = vcombine.high %v74_v7, %v77_v8  ;;  %v287_v18 = vld [vmem:[#allocation8 + $0x78] sm:$0xff]  ;;  %624 = vmatprep.subr.mxu0 %v303_v17  ;;  %v302_v20 = vld [vmem:[#allocation8 + $0xf0] sm:$0xff]  ;;  %v113_v28 = vunpack.c.l.s4 %v867_v27  ;;  %v107_v29 = vunpack.c.0.s8 %v106_v25  ;;  %v301_v61 = vld [vmem:[#allocation8 + $0xe8] sm:$0xff] }
  0x38   :  { %v96_v10 = vadd.f32 %v85_v5, %v84_v4  ;;  %v335_v19 = vld [vmem:[#allocation8 + $0x1f8] sm:$0xff]  ;;  %v286_v22 = vld [vmem:[#allocation8 + $0x70] sm:$0xff]  ;;  %625 = vmatpush3.msra.mxu0 %v287_v18  ;;  %v913_v30 = vshrl.u32 %v108_v26, 7  ;;  %v285_v63 = vld [vmem:[#allocation8 + $0x68] sm:$0xff] }
  0x39   :  { %659 = vmatprep.subr.mxu1 %v335_v19  ;;  %v319_v21 = vld [vmem:[#allocation8 + $0x178] sm:$0xff]  ;;  %v334_v23 = vld [vmem:[#allocation8 + $0x1f0] sm:$0xff]  ;;  %626 = vmatprep.subr.mxu0 %v302_v20  ;;  %v114_v31 = vunpack.c.0.s8 %v113_v28  ;;  %v332_v4 = vld [vmem:[#allocation8 + $0x1e0] sm:$0xff] }
  0x3a   :  { %v97_v12 = vadd.f32 %v96_v10, %v86_v6  ;;  %660 = vmatpush3.msra.mxu1 %v319_v21  ;;  %627 = vmatpush3.msra.mxu0 %v286_v22  ;;  %v916_v32 = vsub.s32 %v107_v29, %v913_v30  ;;  %v318_v62 = vld [vmem:[#allocation8 + $0x170] sm:$0xff]  ;;  %v299_v5 = vld [vmem:[#allocation8 + $0xd8] sm:$0xff]  ;;  %v316_v6 = vld [vmem:[#allocation8 + $0x160] sm:$0xff] }
  0x3b   :  { %661 = vmatprep.subr.mxu1 %v334_v23  ;;  %v919_v33 = vsub.s32 %v114_v31, %v913_v30  ;;  %628 = vmatprep.subr.mxu0 %v301_v61  ;;  %v315_v10 = vld [vmem:[#allocation8 + $0x158] sm:$0xff]  ;;  %v296_v17 = vld [vmem:[#allocation8 + $0xc0] sm:$0xff]  ;;  %v313_v18 = vld [vmem:[#allocation8 + $0x148] sm:$0xff] }
  0x3c   :  { %v98_v14 = vadd.f32 %v97_v12, %v87_v9  ;;  %662 = vmatpush3.msra.mxu1 %v318_v62  ;;  %629 = vmatpush3.msra.mxu0 %v285_v63  ;;  %v298_v9 = vld [vmem:[#allocation8 + $0xd0] sm:$0xff]  ;;  %v280_v19 = vld [vmem:[#allocation8 + $0x40] sm:$0xff]  ;;  %v295_v21 = vld [vmem:[#allocation8 + $0xb8] sm:$0xff] }
  0x3d   :  { %v330_v12 = vld [vmem:[#allocation8 + $0x1d0] sm:$0xff]  ;;  %v328_v20 = vld [vmem:[#allocation8 + $0x1c0] sm:$0xff]  ;;  %v279_v23 = vld [vmem:[#allocation8 + $0x38] sm:$0xff] }
  0x3e   :  { %v99_v15 = vadd.f32 %v98_v14, %v88_v11  ;;  %v282_v11 = vld [vmem:[#allocation8 + $0x50] sm:$0xff]  ;;  %v312_v22 = vld [vmem:[#allocation8 + $0x140] sm:$0xff]  ;;  %v327_v24 = vld [vmem:[#allocation8 + $0x1b8] sm:$0xff] }
  0x3f   :  { %v314_v14 = vld [vmem:[#allocation8 + $0x150] sm:$0xff]  ;;  %v311_v26 = vld [vmem:[#allocation8 + $0x138] sm:$0xff]  ;;  %v293_v29 = vld [vmem:[#allocation8 + $0xa8] sm:$0xff] }
  0x40   :  { %v100_v16 = vadd.f32 %v99_v15, %v89_v13  ;;  %v297_v13 = vld [vmem:[#allocation8 + $0xc8] sm:$0xff]  ;;  %v294_v25 = vld [vmem:[#allocation8 + $0xb0] sm:$0xff]  ;;  %v320_v61 = vld [vmem:[#allocation8 + $0x180] sm:$0xff] }
  0x41   :  { %v281_v15 = vld [vmem:[#allocation8 + $0x48] sm:$0xff]  ;;  %v278_v27 = vld [vmem:[#allocation8 + $0x30] sm:$0xff]  ;;  %v304_v62 = vld [vmem:[#allocation8 + $0x100] sm:$0xff] }
  0x42   :  { %101 = vadd.xlane.f32.xlu0 %v100_v16  ;;  %v329_v16 = vld [vmem:[#allocation8 + $0x1c8] sm:$0xff]  ;;  %v326_v28 = vld [vmem:[#allocation8 + $0x1b0] sm:$0xff]  ;;  %v367_v63 = vld [vmem:[#allocation8 + $0x2f8] sm:$0xff] }
  0x43   :  { %v310_v31 = vld [vmem:[#allocation8 + $0x130] sm:$0xff] }
  0xcb   :  { %v102_v34 = vpop.xlane.xlu0 %101 }
  0xcc   :  { %v103_v35 = vmul.f32 0.0013020834, %v102_v34  ;;  %v277_v34 = vld [vmem:[#allocation8 + $0x28] sm:$0xff] }
  0xce   :  { %v111_v36 = vrot.slane %v103_v35, %v916_v32  ;;  %v118_v37 = vrot.slane %v103_v35, %v919_v33  ;;  %v325_v35 = vld [vmem:[#allocation8 + $0x1a8] sm:$0xff] }
  0xd0   :  { %v923_v38 = vsub.f32 %v72_v0, %v111_v36  ;;  %v925_v39 = vsub.f32 %v73_v1, %v111_v36  ;;  %v927_v40 = vsub.f32 %v75_v2, %v118_v37  ;;  %v929_v41 = vsub.f32 %v74_v7, %v111_v36  ;;  %v333_v0 = vld [vmem:[#allocation8 + $0x1e8] sm:$0xff]  ;;  %v300_v1 = vld [vmem:[#allocation8 + $0xe0] sm:$0xff]  ;;  %v283_v7 = vld [vmem:[#allocation8 + $0x58] sm:$0xff] }
  0xd1   :  { %v931_v42 = vsub.f32 %v76_v3, %v118_v37  ;;  %v933_v43 = vsub.f32 %v77_v8, %v118_v37  ;;  %663 = vmatprep.subr.mxu1 %v333_v0  ;;  %v317_v2 = vld [vmem:[#allocation8 + $0x168] sm:$0xff]  ;;  %630 = vmatprep.subr.mxu0 %v300_v1  ;;  %v284_v3 = vld [vmem:[#allocation8 + $0x60] sm:$0xff]  ;;  %v331_v8 = vld [vmem:[#allocation8 + $0x1d8] sm:$0xff] }
  0xd2   :  { %v127_v44 = vmul.f32 %v923_v38, %v923_v38  ;;  %v128_v45 = vmul.f32 %v925_v39, %v925_v39  ;;  %v130_v46 = vmul.f32 %v927_v40, %v927_v40  ;;  %v129_v50 = vmul.f32 %v929_v41, %v929_v41  ;;  %664 = vmatpush3.msra.mxu1 %v317_v2  ;;  %v292_v36 = vld [vmem:[#allocation8 + $0xa0] sm:$0xff]  ;;  %v309_v37 = vld [vmem:[#allocation8 + $0x128] sm:$0xff] }
  0xd3   :  { %v131_v47 = vmul.f32 %v931_v42, %v931_v42  ;;  %v132_v51 = vmul.f32 %v933_v43, %v933_v43  ;;  %631 = vmatpush3.msra.mxu0 %v284_v3  ;;  %665 = vmatprep.subr.mxu1 %v332_v4  ;;  %v188_v3 = vsub.s32 0, %v913_v30  ;;  %v192_v4 = vsub.s32 1, %v913_v30 }
  0xd4   :  { %v139_v48 = vcombine.low %v127_v44, %v130_v46  ;;  %v140_v49 = vcombine.high %v127_v44, %v130_v46  ;;  %632 = vmatprep.subr.mxu0 %v299_v5  ;;  %666 = vmatpush3.msra.mxu1 %v316_v6  ;;  %v276_v44 = vld [vmem:[#allocation8 + $0x20] sm:$0xff]  ;;  %v291_v46 = vld [vmem:[#allocation8 + $0x98] sm:$0xff] }
  0xd5   :  { %v141_v52 = vcombine.low %v128_v45, %v131_v47  ;;  %v142_v54 = vcombine.high %v128_v45, %v131_v47  ;;  %v143_v56 = vcombine.low %v129_v50, %v132_v51  ;;  %v144_v58 = vcombine.high %v129_v50, %v132_v51  ;;  %633 = vmatpush3.msra.mxu0 %v283_v7  ;;  %v324_v45 = vld [vmem:[#allocation8 + $0x1a0] sm:$0xff]  ;;  %v290_v50 = vld [vmem:[#allocation8 + $0x90] sm:$0xff]  ;;  %v307_v51 = vld [vmem:[#allocation8 + $0x118] sm:$0xff] }
  0xd6   :  { %v151_v53 = vadd.f32 %v140_v49, %v139_v48  ;;  %667 = vmatprep.subr.mxu1 %v331_v8  ;;  %634 = vmatprep.subr.mxu0 %v298_v9  ;;  %v308_v47 = vld [vmem:[#allocation8 + $0x120] sm:$0xff]  ;;  %v275_v48 = vld [vmem:[#allocation8 + $0x18] sm:$0xff]  ;;  %v196_v7 = vsub.s32 2, %v913_v30  ;;  %v200_v8 = vsub.s32 3, %v913_v30  ;;  %v204_v9 = vsub.s32 4, %v913_v30 }
  0xd7   :  { %668 = vmatpush3.msra.mxu1 %v315_v10  ;;  %635 = vmatpush3.msra.mxu0 %v282_v11  ;;  %v323_v49 = vld [vmem:[#allocation8 + $0x198] sm:$0xff]  ;;  %v208_v10 = vsub.s32 5, %v913_v30 }
  0xd8   :  { %v152_v55 = vadd.f32 %v151_v53, %v141_v52  ;;  %669 = vmatprep.subr.mxu1 %v330_v12  ;;  %636 = vmatprep.subr.mxu0 %v297_v13  ;;  %v274_v52 = vld [vmem:[#allocation8 + $0x10] sm:$0xff]  ;;  %v228_v6 = vld [vmem:[#allocation7] sm:$0x3f] }
  0xd9   :  { %670 = vmatpush3.msra.mxu1 %v314_v14  ;;  %637 = vmatpush3.msra.mxu0 %v281_v15  ;;  %v322_v53 = vld [vmem:[#allocation8 + $0x190] sm:$0xff]  ;;  %v233_v13 = vrot.slane %v228_v6, %v188_v3  ;;  %v237_v14 = vrot.slane %v228_v6, %v192_v4 }
  0xda   :  { %v153_v57 = vadd.f32 %v152_v55, %v142_v54  ;;  %671 = vmatprep.subr.mxu1 %v329_v16  ;;  %638 = vmatprep.subr.mxu0 %v296_v17  ;;  %v289_v54 = vld [vmem:[#allocation8 + $0x88] sm:$0xff]  ;;  %v306_v55 = vld [vmem:[#allocation8 + $0x110] sm:$0xff]  ;;  %v241_v17 = vrot.slane %v228_v6, %v196_v7 }
  0xdb   :  { %672 = vmatpush3.msra.mxu1 %v313_v18  ;;  %639 = vmatpush3.msra.mxu0 %v280_v19  ;;  %v184_v5 = vld [vmem:[#allocation5] sm:$0x3f]  ;;  %v245_v18 = vrot.slane %v228_v6, %v200_v8 }
  0xdc   :  { %v154_v59 = vadd.f32 %v153_v57, %v143_v56  ;;  %673 = vmatprep.subr.mxu1 %v328_v20  ;;  %640 = vmatprep.subr.mxu0 %v295_v21  ;;  %v273_v56 = vld [vmem:[#allocation8 + $0x8] sm:$0xff]  ;;  %v189_v11 = vrot.slane %v184_v5, %v188_v3  ;;  %v193_v12 = vrot.slane %v184_v5, %v192_v4  ;;  %v348_v3 = vld [vmem:[#allocation8 + $0x260] sm:$0xff]  ;;  %v363_v4 = vld [vmem:[#allocation8 + $0x2d8] sm:$0xff] }
  0xdd   :  { %674 = vmatpush3.msra.mxu1 %v312_v22  ;;  %641 = vmatpush3.msra.mxu0 %v279_v23  ;;  %v321_v57 = vld [vmem:[#allocation8 + $0x188] sm:$0xff]  ;;  %v197_v15 = vrot.slane %v184_v5, %v196_v7  ;;  %v201_v16 = vrot.slane %v184_v5, %v200_v8  ;;  %v205_v19 = vrot.slane %v184_v5, %v204_v9  ;;  %v346_v7 = vld [vmem:[#allocation8 + $0x250] sm:$0xff] }
  0xde   :  { %v155_v60 = vadd.f32 %v154_v59, %v144_v58  ;;  %675 = vmatprep.subr.mxu1 %v327_v24  ;;  %642 = vmatprep.subr.mxu0 %v294_v25  ;;  %v288_v58 = vld [vmem:[#allocation8 + $0x80] sm:$0xff]  ;;  %v305_v59 = vld [vmem:[#allocation8 + $0x108] sm:$0xff]  ;;  %v209_v20 = vrot.slane %v184_v5, %v208_v10  ;;  %v210_v21 = vcombine.low %v189_v11, %v193_v12  ;;  %v347_v5 = vld [vmem:[#allocation8 + $0x258] sm:$0xff] }
  0xdf   :  { %676 = vmatpush3.msra.mxu1 %v311_v26  ;;  %643 = vmatpush3.msra.mxu0 %v278_v27  ;;  %v211_v22 = vcombine.high %v189_v11, %v193_v12  ;;  %v254_v24 = vcombine.low %v233_v13, %v237_v14  ;;  %v255_v25 = vcombine.high %v233_v13, %v237_v14  ;;  %v361_v8 = vld [vmem:[#allocation8 + $0x2c8] sm:$0xff]  ;;  %v344_v11 = vld [vmem:[#allocation8 + $0x240] sm:$0xff]  ;;  %v359_v12 = vld [vmem:[#allocation8 + $0x2b8] sm:$0xff] }
  0xe0   :  { %156 = vadd.xlane.f32.xlu0 %v155_v60  ;;  %677 = vmatprep.subr.mxu1 %v326_v28  ;;  %v272_v60 = vld [vmem:[#allocation8] sm:$0xff]  ;;  %v249_v26 = vrot.slane %v228_v6, %v204_v9  ;;  %v253_v27 = vrot.slane %v228_v6, %v208_v10  ;;  %v362_v6 = vld [vmem:[#allocation8 + $0x2d0] sm:$0xff]  ;;  %v345_v9 = vld [vmem:[#allocation8 + $0x248] sm:$0xff] }
  0xe1   :  { %644 = vmatprep.subr.mxu0 %v293_v29  ;;  %678 = vmatpush3.msra.mxu1 %v310_v31  ;;  %v212_v29 = vcombine.low %v197_v15, %v201_v16  ;;  %v213_v31 = vcombine.high %v197_v15, %v201_v16  ;;  %v360_v10 = vld [vmem:[#allocation8 + $0x2c0] sm:$0xff]  ;;  %v343_v13 = vld [vmem:[#allocation8 + $0x238] sm:$0xff]  ;;  %v358_v14 = vld [vmem:[#allocation8 + $0x2b0] sm:$0xff] }
  0xe2   :  { %645 = vmatpush3.msra.mxu0 %v277_v34  ;;  %679 = vmatprep.subr.mxu1 %v325_v35  ;;  %v256_v34 = vcombine.low %v241_v17, %v245_v18  ;;  %v257_v35 = vcombine.high %v241_v17, %v245_v18  ;;  %v342_v15 = vld [vmem:[#allocation8 + $0x230] sm:$0xff]  ;;  %v357_v16 = vld [vmem:[#allocation8 + $0x2a8] sm:$0xff]  ;;  %v356_v18 = vld [vmem:[#allocation8 + $0x2a0] sm:$0xff] }
  0xe3   :  { %646 = vmatprep.subr.mxu0 %v292_v36  ;;  %680 = vmatpush3.msra.mxu1 %v309_v37  ;;  %v214_v36 = vcombine.low %v205_v19, %v209_v20  ;;  %v215_v37 = vcombine.high %v205_v19, %v209_v20  ;;  %v341_v17 = vld [vmem:[#allocation8 + $0x228] sm:$0xff]  ;;  %v340_v19 = vld [vmem:[#allocation8 + $0x220] sm:$0xff]  ;;  %v355_v20 = vld [vmem:[#allocation8 + $0x298] sm:$0xff] }
  0xe4   :  { %647 = vmatpush3.msra.mxu0 %v276_v44  ;;  %681 = vmatprep.subr.mxu1 %v324_v45 }
  0xe5   :  { %648 = vmatprep.subr.mxu0 %v291_v46  ;;  %682 = vmatpush3.msra.mxu1 %v308_v47 }
  0xe6   :  { %649 = vmatpush3.msra.mxu0 %v275_v48  ;;  %683 = vmatprep.subr.mxu1 %v323_v49  ;;  %v258_v49 = vcombine.low %v249_v26, %v253_v27 }
  0xe7   :  { %650 = vmatprep.subr.mxu0 %v290_v50  ;;  %684 = vmatpush3.msra.mxu1 %v307_v51 }
  0xe8   :  { %651 = vmatpush3.msra.mxu0 %v274_v52  ;;  %685 = vmatprep.subr.mxu1 %v322_v53 }
  0xe9   :  { %652 = vmatprep.subr.mxu0 %v289_v54  ;;  %686 = vmatpush3.msra.mxu1 %v306_v55 }
  0xea   :  { %653 = vmatpush3.msra.mxu0 %v273_v56  ;;  %687 = vmatprep.subr.mxu1 %v321_v57 }
  0xeb   :  { %654 = vmatprep.subr.mxu0 %v288_v58  ;;  %688 = vmatpush3.msra.mxu1 %v305_v59 }
  0xec   :  { %655 = vmatpush3.msra.mxu0 %v272_v60  ;;  %689 = vmatprep.subr.mxu1 %v320_v61  ;;  %v351_v60 = vld [vmem:[#allocation8 + $0x278] sm:$0xff]  ;;  %v366_v61 = vld [vmem:[#allocation8 + $0x2f0] sm:$0xff] }
  0xed   :  { %690 = vmatpush3.msra.mxu1 %v304_v62  ;;  %694 = vmatprep.subr.mxu0 %v367_v63  ;;  %v350_v63 = vld [vmem:[#allocation8 + $0x270] sm:$0xff] }
 0x169   :  { %v157_v0 = vpop.xlane.xlu0 %156 }
 0x16a   :  { %v158_v1 = vmul.f32 0.0013020834, %v157_v0  ;;  %v365_v0 = vld [vmem:[#allocation8 + $0x2e8] sm:$0xff] }
 0x16c   :  { %v159_v2 = vadd.f32 1e-06, %v158_v1  ;;  %v349_v1 = vld [vmem:[#allocation8 + $0x268] sm:$0xff] }
 0x16e   :  { %748 = vrsqrt.f32 %v159_v2  ;;  %v364_v2 = vld [vmem:[#allocation8 + $0x2e0] sm:$0xff] }
 0x17b   :  { %v749_v23 = vpop.eup %748 }
 0x17c   :  { %v168_v28 = vrot.slane %v749_v23, %v916_v32  ;;  %v175_v30 = vrot.slane %v749_v23, %v919_v33  ;;  %v259_v33 = vcombine.high %v249_v26, %v253_v27  ;;  %v338_v23 = vld [vmem:[#allocation8 + $0x210] sm:$0xff]  ;;  %v352_v26 = vld [vmem:[#allocation8 + $0x280] sm:$0xff] }
 0x17d   :  { %v336_v27 = vld [vmem:[#allocation8 + $0x200] sm:$0xff] }
 0x17e   :  { %v178_v44 = vmul.f32 %v168_v28, %v923_v38  ;;  %v181_v45 = vmul.f32 %v175_v30, %v927_v40  ;;  %v179_v46 = vmul.f32 %v168_v28, %v925_v39  ;;  %v182_v47 = vmul.f32 %v175_v30, %v931_v42 }
 0x17f   :  { %v180_v48 = vmul.f32 %v168_v28, %v929_v41  ;;  %v183_v32 = vmul.f32 %v175_v30, %v933_v43 }
 0x180   :  { %v222_v50 = vmul.f32 %v210_v21, %v178_v44  ;;  %v225_v51 = vmul.f32 %v211_v22, %v181_v45  ;;  %v223_v52 = vmul.f32 %v212_v29, %v179_v46  ;;  %v226_v53 = vmul.f32 %v213_v31, %v182_v47  ;;  %v339_v21 = vld [vmem:[#allocation8 + $0x218] sm:$0xff]  ;;  %v354_v22 = vld [vmem:[#allocation8 + $0x290] sm:$0xff] }
 0x181   :  { %v224_v54 = vmul.f32 %v214_v36, %v180_v48  ;;  %v227_v55 = vmul.f32 %v215_v37, %v183_v32 }
 0x182   :  { %v266_v56 = vadd.f32 %v254_v24, %v222_v50  ;;  %v269_v38 = vadd.f32 %v255_v25, %v225_v51  ;;  %v267_v57 = vadd.f32 %v256_v34, %v223_v52  ;;  %v270_v40 = vadd.f32 %v257_v35, %v226_v53  ;;  %v353_v24 = vld [vmem:[#allocation8 + $0x288] sm:$0xff]  ;;  %v623_v35 = vld [vmem:[%s979_s4] ss:$0 sm:$0xff] }
 0x183   :  { %v961_v58 = vadd.f32 %v258_v49, %v224_v54  ;;  %v963_v39 = vadd.f32 %v259_v33, %v227_v55  ;;  %v337_v25 = vld [vmem:[#allocation8 + $0x208] sm:$0xff] }
 0x184   :  { %v382_v42 = vcombine.high %v266_v56, %v269_v38  ;;  %v384_v41 = vcombine.high %v267_v57, %v270_v40  ;;  %v381_v59 = vcombine.low %v266_v56, %v269_v38  ;;  %v383_v43 = vcombine.low %v267_v57, %v270_v40 }
 0x185   :  { %v386_v62 = vcombine.high %v961_v58, %v963_v39  ;;  %v385_v28 = vcombine.low %v961_v58, %v963_v39 }
 0x186   :  { %457 = vmatprep.mubr.f32.mxu0 %v382_v42  ;;  %527 = vmatprep.mubr.f32.mxu1 %v384_v41 }
 0x187   :  { %458 = vmatmul.mubr.f32.vlgmr.msra.gmra.mxu0 %v381_v59  ;;  %528 = vmatmul.mubr.f32.vlgmr.msra.gmra.mxu1 %v383_v43 }
 0x188   :  { %695 = vmatpush3.msra.mxu0 %v351_v60  ;;  %597 = vmatprep.mubr.f32.mxu0 %v386_v62 }
 0x189   :  { %696 = vmatprep.subr.mxu0 %v366_v61 }
 0x18a   :  { %697 = vmatpush3.msra.mxu0 %v350_v63 }
 0x18b   :  { %698 = vmatprep.subr.mxu0 %v365_v0 }
 0x18c   :  { %699 = vmatpush3.msra.mxu0 %v349_v1 }
 0x18d   :  { %700 = vmatprep.subr.mxu0 %v364_v2 }
 0x18e   :  { %701 = vmatpush3.msra.mxu0 %v348_v3 }
 0x18f   :  { %702 = vmatprep.subr.mxu0 %v363_v4 }
 0x190   :  { %703 = vmatpush3.msra.mxu0 %v347_v5 }
 0x191   :  { %704 = vmatprep.subr.mxu0 %v362_v6 }
 0x192   :  { %705 = vmatpush3.msra.mxu0 %v346_v7 }
 0x193   :  { %706 = vmatprep.subr.mxu0 %v361_v8 }
 0x194   :  { %707 = vmatpush3.msra.mxu0 %v345_v9 }
 0x195   :  { %708 = vmatprep.subr.mxu0 %v360_v10 }
 0x196   :  { %709 = vmatpush3.msra.mxu0 %v344_v11 }
 0x197   :  { %710 = vmatprep.subr.mxu0 %v359_v12 }
 0x198   :  { %711 = vmatpush3.msra.mxu0 %v343_v13 }
 0x199   :  { %712 = vmatprep.subr.mxu0 %v358_v14 }
 0x19a   :  { %713 = vmatpush3.msra.mxu0 %v342_v15 }
 0x19b   :  { %714 = vmatprep.subr.mxu0 %v357_v16 }
 0x19c   :  { %715 = vmatpush3.msra.mxu0 %v341_v17 }
 0x19d   :  { %716 = vmatprep.subr.mxu0 %v356_v18 }
 0x19e   :  { %717 = vmatpush3.msra.mxu0 %v340_v19 }
 0x19f   :  { %718 = vmatprep.subr.mxu0 %v355_v20 }
 0x1a0   :  { %719 = vmatpush3.msra.mxu0 %v339_v21 }
 0x1a1   :  { %720 = vmatprep.subr.mxu0 %v354_v22 }
 0x1a2   :  { %721 = vmatpush3.msra.mxu0 %v338_v23 }
 0x1a3   :  { %722 = vmatprep.subr.mxu0 %v353_v24 }
 0x1a4   :  { %723 = vmatpush3.msra.mxu0 %v337_v25 }
 0x1a5   :  { %724 = vmatprep.subr.mxu0 %v352_v26 }
 0x1a6   :  { %725 = vmatpush3.msra.mxu0 %v336_v27 }
 0x1a7   :  { %598 = vmatmul.mubr.f32.vlgmr.msra.gmra.mxu0 %v385_v28 }
 0x247   :  { %v656_v30 = vpop.f32.mrf.mxu0  ;;  %v691_v31 = vpop.f32.mrf.mxu1 }
 0x249   :  { %v657_v29 = vpop.f32.mrf.mxu0  ;;  %v692_v36 = vpop.f32.mrf.mxu1 }
 0x24a   :  { %v658_v34 = vadd.f32 %v657_v29, %v656_v30  ;;  %v693_v45 = vadd.f32 %v692_v36, %v691_v31 }
 0x24c   :  { %v460_v37 = vadd.f32 %v658_v34, %v623_v35 }
 0x24e   :  { %v530_v47 = vadd.f32 %v693_v45, %v460_v37 }
 0x267   :  { %v726_v44 = vpop.f32.mrf.mxu0 }
 0x269   :  { %v727_v46 = vpop.f32.mrf.mxu0 }
 0x26a   :  { %v728_v48 = vadd.f32 %v727_v46, %v726_v44 }
 0x26c   :  { %v600_v32 = vadd.f32 %v728_v48, %v530_v47 }
 0x26e   :  { %603 = vst [vmem:[#allocation10] sm:$0xff] %v600_v32 }
 0x26f   :  { %608 = vsyncadd [#allocation4], 64  ;;  %s868_s16 = smov [#allocation10]  }
 0x270   :  { %s609_s17 = sshll.u32 %s868_s16, 4  ;;  %s610_s17 = int_to_ptr.vmem [resolvable:$true] %s609_s17 }
 0x271   :  { %s830_s18 = scalar_lea.vmem %s610_s17, 64  ;;  %s834_s19 = scalar_lea.vmem %s610_s17, 128 }
 0x272   :  { %p831_p6 = scmp.ne.s32.totalorder %s610_s17, %s830_s18  ;;  %p835_p7 = scmp.lt.s32.totalorder %s610_s17, %s610_s17 }
 0x273   :  { %p836_p8 = scmp.lt.s32.totalorder %s834_s19, %s830_s18 }
 0x275   :  { %p837_p9 = por %p836_p8, %p835_p7 }
 0x277   :  { %p838_p10 = pnand %p837_p9, %p831_p6 }
 0x279   :  { %841 = shalt.err (!%p838_p10)
}
 0x27a   :  { %s869_s4 = smov 64   ;;  %s870_s20 = smov 4  }
 0x27b   :  { %615 = dma.vmem_to_hbm [thread:$0]  %s610_s17, 64, %s980_s5, [#allocation4], %s869_s4, %s869_s4, %s870_s20  }
 0x27c   :  { %856 = dma.done.wait [#allocation4], 128  }
 0x27d   :  { %857 = vsyncadd [#allocation4], 4294967168 }
 0x27e   :  { %619 = vsyncpa [#allocation3], 1 }
 0x27f   :  { %620 = vsyncpa [#allocation6], 1 }
 0x280   :  { %621 = vsyncpa [#allocation9], 1 }
 0x281   :  { %622 = vsyncpa [#allocation4], 1 }

</bundles_post_ra>
